<compile_context>
chip_gen: v7x
topology: tpu7x:2x2x1
jax: 0.10.0
libtpu: 0.0.40
codegen_flags: <defaults>
</compile_context>

<pallas_src>
import functools

import jax
import jax.numpy as jnp
from jax.experimental import pallas as pl
from jax.experimental.pallas import tpu as pltpu


def _resblock_kernel(g_ref, r_ref, gh_ref, rh_ref, w_ref, b_ref, go_ref, ro_ref,
                     *, cout, merged):
    """One (batch, L-tile) grid step.

    g_ref, r_ref  : (Cin, TL)          activation tiles (compute dtype)
    gh_ref, rh_ref: (Cin, 2)           [left, right] neighbour columns of this tile
    w_ref         : (4*Cout, 6*Cin)    block-diag folded weights       (merged)
                    (2, 2*Cout, 3*Cin) per-branch folded weights       (unmerged)
    b_ref         : (2, Cout, 1)       folded BN shift per branch (f32)
    go_ref, ro_ref: (Cout, TL)         outputs (lane-dense along L)
    """
    tl = g_ref.shape[-1]

    def shifted_views(x_ref, h_ref):
        # Input-side im2col: x[l-1], x[l], x[l+1]; the halo columns supply the tile
        # edges (zeros at the sequence ends = Conv1d padding=1).  Shifting the small
        # Cin operand keeps the matmul output lane-aligned.
        x = x_ref[...]
        h = h_ref[...]
        left = jnp.concatenate([h[:, 0:1], x[:, : tl - 1]], axis=1)   # x[l-1]
        right = jnp.concatenate([x[:, 1:], h[:, 1:2]], axis=1)        # x[l+1]
        return left, x, right

    gl, gm, gr = shifted_views(g_ref, gh_ref)
    rl, rm, rr = shifted_views(r_ref, rh_ref)

    def epilogue(y, bias):
        # f32: BN shift -> ReLU -> (Dropout = identity in eval) -> + skip conv
        return jnp.maximum(y[:cout] + bias, 0.0) + y[cout:2 * cout]

    if merged:
        rhs = jnp.concatenate([gl, gm, gr, rl, rm, rr], axis=0)        # (6*Cin, TL)
        y = jnp.dot(w_ref[...], rhs, preferred_element_type=jnp.float32)
        go_ref[...] = epilogue(y[: 2 * cout], b_ref[0]).astype(go_ref.dtype)
        ro_ref[...] = epilogue(y[2 * cout:], b_ref[1]).astype(ro_ref.dtype)
    else:
        y_g = jnp.dot(w_ref[0], jnp.concatenate([gl, gm, gr], axis=0),
                      preferred_element_type=jnp.float32)
        y_r = jnp.dot(w_ref[1], jnp.concatenate([rl, rm, rr], axis=0),
                      preferred_element_type=jnp.float32)
        go_ref[...] = epilogue(y_g, b_ref[0]).astype(go_ref.dtype)
        ro_ref[...] = epilogue(y_r, b_ref[1]).astype(ro_ref.dtype)


def _fold_branch(w3, skip_w, gamma, beta, mean, var, eps):
    """Fold eval-mode BN scale into the conv taps.  Row layout:
    rows [0, Cout)      = [tap0 | tap1 | tap2]   (BN-scaled conv)
    rows [Cout, 2*Cout) = [0    | skip | 0   ]   (1x1 skip conv uses the mid block)."""
    cout, cin, _ = w3.shape
    scale = gamma / jnp.sqrt(var + eps)
    shift = beta - mean * scale
    wb = jnp.zeros((2 * cout, 3 * cin), jnp.float32)
    for k in range(3):
        wb = wb.at[:cout, k * cin:(k + 1) * cin].set(w3[:, :, k] * scale[:, None])
    wb = wb.at[cout:, cin:2 * cin].set(skip_w)
    return wb, shift.reshape(cout, 1)


def _boundary_columns(x, tl, n_tiles, L):
    """(N, Cin, L) -> (N, n_tiles, Cin, 2): the column just left / right of each L tile
    (zeros at the sequence ends).  Tiny; replaces staging overlapping halo windows."""
    N, cin = x.shape[0], x.shape[1]
    zero = jnp.zeros((N, cin, 1), x.dtype)
    lefts, rights = [], []
    for j in range(n_tiles):
        li, ri = j * tl - 1, (j + 1) * tl
        lefts.append(x[:, :, li:li + 1] if li >= 0 else zero)
        rights.append(x[:, :, ri:ri + 1] if ri < L else zero)
    return jnp.concatenate(
        [jnp.stack(lefts, axis=1), jnp.stack(rights, axis=1)], axis=-1)


def _vmem_capacity_bytes():
    try:
        return int(pltpu.get_tpu_info().vmem_capacity_bytes)
    except Exception:
        return 64 * 1024 * 1024      # conservative: v7x has the smallest physical VMEM


def _plan_tiles(N, L, cin, cout, in_bytes, max_tl=None):
    """Pick the L tile (multiple of 128 when tiling) and the VMEM limit from chip info."""
    cap = _vmem_capacity_bytes()
    vmem_limit = min(int(cap * 0.75), 100 * 1024 * 1024)   # ~48 MiB v7x, ~96 MiB v5e/v6e
    budget = int(cap * 0.55)
    # per-column footprint: double-buffered in/out tiles + im2col RHS + f32 matmul result
    per_col = 14 * cin * in_bytes + 32 * cout
    tl_max = max(128, min(8192, (budget // per_col) // 128 * 128))
    if max_tl is not None:
        tl_max = max(128, min(tl_max, max_tl))
    if L <= tl_max:
        tl, n_tiles = L, 1
        # v7x has 2 TensorCores: give single-batch calls 2 grid steps when it costs no
        # padding copy (harmless on 1-TC v5e/v6e).
        if N == 1 and L >= 256 and L % 256 == 0:
            tl, n_tiles = L // 2, 2
    else:
        tl = tl_max
        n_tiles = -(-L // tl)
    # Guard: never set a limit below the estimated footprint (large Cin/Cout cases).
    est = 2 * tl * per_col + 24 * cout * cin * in_bytes + (1 << 20)
    vmem_limit = min(cap, max(vmem_limit, est))
    return tl, n_tiles, int(vmem_limit)


def resblock_forward(g_ncl, r_ncl, params, eps=1e-5, compute_dtype=None, max_tl=None):
    """g_ncl, r_ncl: (N, Cin, L) like PyTorch.  Returns (g_out, r_out) as (N, Cout, L) f32.

    compute_dtype: dtype of the matmul operands (activations + folded weights).
    Pass jnp.bfloat16 (or feed bf16 activations) to halve HBM traffic on this
    memory-bound op; accumulation and the bias/ReLU/skip epilogue stay f32.
    If Cin == Cout the original module has no skip conv; pass identity matrices
    as e_skip_w / g_skip_w to reproduce that.
    """
    N, Cin, L = g_ncl.shape
    Cout = params["e_w"].shape[0]                      # torch conv weight: (Cout, Cin, 3)
    cdtype = jnp.dtype(compute_dtype) if compute_dtype is not None else g_ncl.dtype
    tl, n_tiles, vmem_limit = _plan_tiles(N, L, Cin, Cout, jnp.dtype(cdtype).itemsize,
                                          max_tl=max_tl)
    lp = tl * n_tiles
    merged = Cin <= 64        # block-diag zero K-padding is free on the MXU

    # If the caller's activations are f32 this cast is one extra (half-size) HBM pass;
    # feed bf16 activations directly to get the full bandwidth win.
    g = g_ncl.astype(cdtype)
    r = r_ncl.astype(cdtype)
    g_halo = _boundary_columns(g, tl, n_tiles, L)
    r_halo = _boundary_columns(r, tl, n_tiles, L)
    if lp != L:
        # TODO(synk): only hit for very long sequences that don't divide the L tile;
        # costs one pad copy of the activations.
        g = jnp.pad(g, ((0, 0), (0, 0), (0, lp - L)))
        r = jnp.pad(r, ((0, 0), (0, 0), (0, lp - L)))

    we, be = _fold_branch(params["e_w"], params["e_skip_w"], params["e_gamma"],
                          params["e_beta"], params["e_mean"], params["e_var"], eps)
    wg, bg = _fold_branch(params["g_w"], params["g_skip_w"], params["g_gamma"],
                          params["g_beta"], params["g_mean"], params["g_var"], eps)
    if merged:
        w_all = jnp.zeros((4 * Cout, 6 * Cin), jnp.float32)
        w_all = w_all.at[:2 * Cout, :3 * Cin].set(we).at[2 * Cout:, 3 * Cin:].set(wg)
        w_spec = pl.BlockSpec((4 * Cout, 6 * Cin), lambda n, j: (0, 0))
    else:
        w_all = jnp.stack([we, wg])                    # (2, 2*Cout, 3*Cin)
        w_spec = pl.BlockSpec((2, 2 * Cout, 3 * Cin), lambda n, j: (0, 0, 0))
    w_all = w_all.astype(cdtype)
    bias = jnp.stack([be, bg])                         # (2, Cout, 1) f32

    kernel = functools.partial(_resblock_kernel, cout=Cout, merged=merged)
    out_sds = jax.ShapeDtypeStruct((N, Cout, lp), jnp.float32)

    # (Optional sweep: pipeline_mode=pl.Buffered(3) on x_spec can hide DMA start
    #  latency when Cin is small; left at the default depth to stay VMEM-safe on v7x.)
    x_spec = pl.BlockSpec((None, Cin, tl), lambda n, j: (n, 0, j))
    h_spec = pl.BlockSpec((None, None, Cin, 2), lambda n, j: (n, j, 0, 0))
    out_spec = pl.BlockSpec((None, Cout, tl), lambda n, j: (n, 0, j))

    g_out, r_out = pl.pallas_call(
        kernel,
        out_shape=(out_sds, out_sds),
        grid_spec=pltpu.PrefetchScalarGridSpec(
            num_scalar_prefetch=0,
            grid=(N, n_tiles),                          # both parallel: feeds 2 TCs on v7x
            in_specs=[
                x_spec,                                 # g tiles (read in place, no staging)
                x_spec,                                 # r tiles
                h_spec,                                 # g boundary columns
                h_spec,                                 # r boundary columns
                w_spec,                                 # resident folded weights
                pl.BlockSpec((2, Cout, 1), lambda n, j: (0, 0, 0)),   # resident BN shift
            ],
            out_specs=[out_spec, out_spec],
        ),
        compiler_params=pltpu.CompilerParams(
            dimension_semantics=("parallel", "parallel"),
            vmem_limit_bytes=vmem_limit,
        ),
    )(g, r, g_halo, r_halo, w_all, bias)

    if lp != L:                                         # drop tiling pad along L
        g_out, r_out = g_out[:, :, :L], r_out[:, :, :L]
    return g_out, r_out


def _make_params(key, cin, cout):
    ks = jax.random.split(key, 12)
    bound3 = (6.0 / (cin * 3 + cout * 3)) ** 0.5        # xavier_uniform for k=3 conv
    bound1 = (6.0 / (cin + cout)) ** 0.5
    return {
        "e_w": jax.random.uniform(ks[0], (cout, cin, 3), jnp.float32, -bound3, bound3),
        "g_w": jax.random.uniform(ks[1], (cout, cin, 3), jnp.float32, -bound3, bound3),
        "e_skip_w": jax.random.uniform(ks[2], (cout, cin), jnp.float32, -bound1, bound1),
        "g_skip_w": jax.random.uniform(ks[3], (cout, cin), jnp.float32, -bound1, bound1),
        "e_gamma": jax.random.uniform(ks[4], (cout,), jnp.float32, 0.5, 1.5),
        "e_beta": jax.random.normal(ks[5], (cout,), jnp.float32) * 0.1,
        "e_mean": jax.random.normal(ks[6], (cout,), jnp.float32) * 0.1,
        "e_var": jax.random.uniform(ks[7], (cout,), jnp.float32, 0.5, 1.5),
        "g_gamma": jax.random.uniform(ks[8], (cout,), jnp.float32, 0.5, 1.5),
        "g_beta": jax.random.normal(ks[9], (cout,), jnp.float32) * 0.1,
        "g_mean": jax.random.normal(ks[10], (cout,), jnp.float32) * 0.1,
        "g_var": jax.random.uniform(ks[11], (cout,), jnp.float32, 0.5, 1.5),
    }


def _reference(g, r, params, eps=1e-5):
    """Pure-JAX eval-mode ResBlock reference (NCL layout, torch weight layout)."""
    hp = jax.lax.Precision.HIGHEST

    def branch(x, w3, skip_w, gamma, beta, mean, var):
        L = x.shape[2]
        xp = jnp.pad(x, ((0, 0), (0, 0), (1, 1)))
        conv = sum(jnp.einsum("oc,ncl->nol", w3[:, :, k], xp[:, :, k:k + L], precision=hp)
                   for k in range(3))
        scale = gamma / jnp.sqrt(var + eps)
        bn = conv * scale[None, :, None] + (beta - mean * scale)[None, :, None]
        res = jnp.einsum("oc,ncl->nol", skip_w, x, precision=hp)
        return jnp.maximum(bn, 0.0) + res

    g_out = branch(g, params["e_w"], params["e_skip_w"], params["e_gamma"],
                   params["e_beta"], params["e_mean"], params["e_var"])
    r_out = branch(r, params["g_w"], params["g_skip_w"], params["g_gamma"],
                   params["g_beta"], params["g_mean"], params["g_var"])
    return g_out, r_out


if __name__ == "__main__":
    N, CIN, COUT, L = 2, 4, 8, 16
    key = jax.random.PRNGKey(0)
    k_g, k_r, k_p, k_g2, k_r2 = jax.random.split(key, 5)

    g = jax.random.normal(k_g, (N, CIN, L), jnp.float32)
    r = jax.random.normal(k_r, (N, CIN, L), jnp.float32)
    params = _make_params(k_p, CIN, COUT)

    # 1) f32 path, single-tile (zero-copy) -- tight check.
    g_out, r_out = resblock_forward(g, r, params)
    jax.block_until_ready((g_out, r_out))
    g_ref, r_ref = _reference(g, r, params)
    assert g_out.shape == (N, COUT, L) and r_out.shape == (N, COUT, L)
    assert jnp.allclose(g_out, g_ref, atol=2e-4, rtol=2e-4)
    assert jnp.allclose(r_out, r_ref, atol=2e-4, rtol=2e-4)

    # 2) bf16 matmul operands (halved activation/weight DMA bytes) -- looser tolerance.
    g_bf, r_bf = resblock_forward(g, r, params, compute_dtype=jnp.bfloat16)
    jax.block_until_ready((g_bf, r_bf))
    assert jnp.allclose(g_bf, g_ref, atol=5e-2, rtol=5e-2)
    assert jnp.allclose(r_bf, r_ref, atol=5e-2, rtol=5e-2)

    # 3) Multi-tile path (forced small L tile) with halos + ragged-L padding.
    L2 = 300
    g2 = jax.random.normal(k_g2, (N, CIN, L2), jnp.float32)
    r2 = jax.random.normal(k_r2, (N, CIN, L2), jnp.float32)
    g2_out, r2_out = resblock_forward(g2, r2, params, max_tl=128)
    jax.block_until_ready((g2_out, r2_out))
    g2_ref, r2_ref = _reference(g2, r2, params)
    assert g2_out.shape == (N, COUT, L2) and r2_out.shape == (N, COUT, L2)
    assert jnp.allclose(g2_out, g2_ref, atol=2e-4, rtol=2e-4)
    assert jnp.allclose(r2_out, r2_ref, atol=2e-4, rtol=2e-4)

    print("KERNEL_OK")
</pallas_src>

<mosaic_0001>
module attributes {stable_mosaic.version = 11 : i64} {
  func.func @_resblock_kernel(%arg0: i32, %arg1: i32, %arg2: memref<1x4x16xf32, #tpu.memory_space<vmem>>, %arg3: memref<1x4x16xf32, #tpu.memory_space<vmem>>, %arg4: memref<1x1x4x2xf32, #tpu.memory_space<vmem>>, %arg5: memref<1x1x4x2xf32, #tpu.memory_space<vmem>>, %arg6: memref<32x24xf32, #tpu.memory_space<vmem>>, %arg7: memref<2x8x1xf32, #tpu.memory_space<vmem>>, %arg8: memref<1x8x16xf32, #tpu.memory_space<vmem>>, %arg9: memref<1x8x16xf32, #tpu.memory_space<vmem>>) attributes {dimension_semantics = [#tpu.dimension_semantics<parallel>, #tpu.dimension_semantics<parallel>], iteration_bounds = array<i64: 2, 1>, scalar_prefetch = 0 : i64, scratch_operands = 0 : i64, tpu.core_type = #tpu.core_type<tc>, window_params = [{transform_indices = @transform_0, window_bounds = array<i64: 1, 4, 16>}, {transform_indices = @transform_1, window_bounds = array<i64: 1, 4, 16>}, {transform_indices = @transform_2, window_bounds = array<i64: 1, 1, 4, 2>}, {transform_indices = @transform_3, window_bounds = array<i64: 1, 1, 4, 2>}, {pipeline_mode = #tpu.pipeline_mode<synchronous>, transform_indices = @transform_4, window_bounds = array<i64: 32, 24>}, {pipeline_mode = #tpu.pipeline_mode<synchronous>, transform_indices = @transform_5, window_bounds = array<i64: 2, 8, 1>}, {transform_indices = @transform_6, window_bounds = array<i64: 1, 8, 16>}, {transform_indices = @transform_7, window_bounds = array<i64: 1, 8, 16>}]} {
    %c0 = arith.constant 0 : index
    %c0_0 = arith.constant 0 : index
    %c0_1 = arith.constant 0 : index
    %0 = vector.load %arg2[%c0, %c0_0, %c0_1] : memref<1x4x16xf32, #tpu.memory_space<vmem>>, vector<1x4x16xf32>
    %1 = vector.shape_cast %0 : vector<1x4x16xf32> to vector<4x16xf32>
    %c0_2 = arith.constant 0 : index
    %c0_3 = arith.constant 0 : index
    %c0_4 = arith.constant 0 : index
    %c0_5 = arith.constant 0 : index
    %2 = vector.load %arg4[%c0_2, %c0_3, %c0_4, %c0_5] : memref<1x1x4x2xf32, #tpu.memory_space<vmem>>, vector<1x1x4x2xf32>
    %3 = vector.shape_cast %2 : vector<1x1x4x2xf32> to vector<4x2xf32>
    %4 = vector.extract_strided_slice %3 {offsets = [0, 0], sizes = [4, 1], strides = [1, 1]} : vector<4x2xf32> to vector<4x1xf32>
    %5 = vector.extract_strided_slice %1 {offsets = [0, 0], sizes = [4, 15], strides = [1, 1]} : vector<4x16xf32> to vector<4x15xf32>
    %6 = tpu.concatenate %4, %5 in 1 : vector<4x1xf32>, vector<4x15xf32> -> vector<4x16xf32>
    %7 = vector.extract_strided_slice %1 {offsets = [0, 1], sizes = [4, 15], strides = [1, 1]} : vector<4x16xf32> to vector<4x15xf32>
    %8 = vector.extract_strided_slice %3 {offsets = [0, 1], sizes = [4, 1], strides = [1, 1]} : vector<4x2xf32> to vector<4x1xf32>
    %9 = tpu.concatenate %7, %8 in 1 : vector<4x15xf32>, vector<4x1xf32> -> vector<4x16xf32>
    %c0_6 = arith.constant 0 : index
    %c0_7 = arith.constant 0 : index
    %c0_8 = arith.constant 0 : index
    %10 = vector.load %arg3[%c0_6, %c0_7, %c0_8] : memref<1x4x16xf32, #tpu.memory_space<vmem>>, vector<1x4x16xf32>
    %11 = vector.shape_cast %10 : vector<1x4x16xf32> to vector<4x16xf32>
    %c0_9 = arith.constant 0 : index
    %c0_10 = arith.constant 0 : index
    %c0_11 = arith.constant 0 : index
    %c0_12 = arith.constant 0 : index
    %12 = vector.load %arg5[%c0_9, %c0_10, %c0_11, %c0_12] : memref<1x1x4x2xf32, #tpu.memory_space<vmem>>, vector<1x1x4x2xf32>
    %13 = vector.shape_cast %12 : vector<1x1x4x2xf32> to vector<4x2xf32>
    %14 = vector.extract_strided_slice %13 {offsets = [0, 0], sizes = [4, 1], strides = [1, 1]} : vector<4x2xf32> to vector<4x1xf32>
    %15 = vector.extract_strided_slice %11 {offsets = [0, 0], sizes = [4, 15], strides = [1, 1]} : vector<4x16xf32> to vector<4x15xf32>
    %16 = tpu.concatenate %14, %15 in 1 : vector<4x1xf32>, vector<4x15xf32> -> vector<4x16xf32>
    %17 = vector.extract_strided_slice %11 {offsets = [0, 1], sizes = [4, 15], strides = [1, 1]} : vector<4x16xf32> to vector<4x15xf32>
    %18 = vector.extract_strided_slice %13 {offsets = [0, 1], sizes = [4, 1], strides = [1, 1]} : vector<4x2xf32> to vector<4x1xf32>
    %19 = tpu.concatenate %17, %18 in 1 : vector<4x15xf32>, vector<4x1xf32> -> vector<4x16xf32>
    %20 = tpu.concatenate %6, %1, %9, %16, %11, %19 in 0 : vector<4x16xf32>, vector<4x16xf32>, vector<4x16xf32>, vector<4x16xf32>, vector<4x16xf32>, vector<4x16xf32> -> vector<24x16xf32>
    %c0_13 = arith.constant 0 : index
    %c0_14 = arith.constant 0 : index
    %21 = vector.load %arg6[%c0_13, %c0_14] : memref<32x24xf32, #tpu.memory_space<vmem>>, vector<32x24xf32>
    %cst = arith.constant dense<0.000000e+00> : vector<32x16xf32>
    %22 = tpu.matmul %21, %20, %cst {dimension_numbers = #tpu.dot_dimension_numbers<[1], [0], [0], [1], [0, 0, 1, 1], [], []>} : vector<32x24xf32>, vector<24x16xf32>, vector<32x16xf32> -> vector<32x16xf32>
    %23 = vector.extract_strided_slice %22 {offsets = [0, 0], sizes = [16, 16], strides = [1, 1]} : vector<32x16xf32> to vector<16x16xf32>
    %c0_15 = arith.constant 0 : index
    %c0_16 = arith.constant 0 : index
    %c0_17 = arith.constant 0 : index
    %24 = vector.load %arg7[%c0_15, %c0_16, %c0_17] : memref<2x8x1xf32, #tpu.memory_space<vmem>>, vector<1x8x1xf32>
    %25 = vector.shape_cast %24 : vector<1x8x1xf32> to vector<8x1xf32>
    %26 = vector.extract_strided_slice %23 {offsets = [0, 0], sizes = [8, 16], strides = [1, 1]} : vector<16x16xf32> to vector<8x16xf32>
    %27 = vector.broadcast %25 : vector<8x1xf32> to vector<8x16xf32>
    %28 = arith.addf %26, %27 : vector<8x16xf32>
    %cst_18 = arith.constant 0.000000e+00 : f32
    %29 = vector.broadcast %cst_18 : f32 to vector<8x16xf32>
    %30 = arith.maximumf %28, %29 : vector<8x16xf32>
    %31 = vector.extract_strided_slice %23 {offsets = [8, 0], sizes = [8, 16], strides = [1, 1]} : vector<16x16xf32> to vector<8x16xf32>
    %32 = arith.addf %30, %31 : vector<8x16xf32>
    %c0_19 = arith.constant 0 : index
    %c0_20 = arith.constant 0 : index
    %c0_21 = arith.constant 0 : index
    %33 = vector.load %arg8[%c0_19, %c0_20, %c0_21] : memref<1x8x16xf32, #tpu.memory_space<vmem>>, vector<1x8x16xf32>
    %34 = vector.shape_cast %33 : vector<1x8x16xf32> to vector<8x16xf32>
    %35 = vector.shape_cast %32 : vector<8x16xf32> to vector<1x8x16xf32>
    tpu.vector_store %arg8[%c0_19, %c0_20, %c0_21], %35 {strides = array<i32>} : memref<1x8x16xf32, #tpu.memory_space<vmem>>, vector<1x8x16xf32>,
    %36 = vector.extract_strided_slice %22 {offsets = [16, 0], sizes = [16, 16], strides = [1, 1]} : vector<32x16xf32> to vector<16x16xf32>
    %c1 = arith.constant 1 : index
    %c0_22 = arith.constant 0 : index
    %c0_23 = arith.constant 0 : index
    %37 = vector.load %arg7[%c1, %c0_22, %c0_23] : memref<2x8x1xf32, #tpu.memory_space<vmem>>, vector<1x8x1xf32>
    %38 = vector.shape_cast %37 : vector<1x8x1xf32> to vector<8x1xf32>
    %39 = vector.extract_strided_slice %36 {offsets = [0, 0], sizes = [8, 16], strides = [1, 1]} : vector<16x16xf32> to vector<8x16xf32>
    %40 = vector.broadcast %38 : vector<8x1xf32> to vector<8x16xf32>
    %41 = arith.addf %39, %40 : vector<8x16xf32>
    %cst_24 = arith.constant 0.000000e+00 : f32
    %42 = vector.broadcast %cst_24 : f32 to vector<8x16xf32>
    %43 = arith.maximumf %41, %42 : vector<8x16xf32>
    %44 = vector.extract_strided_slice %36 {offsets = [8, 0], sizes = [8, 16], strides = [1, 1]} : vector<16x16xf32> to vector<8x16xf32>
    %45 = arith.addf %43, %44 : vector<8x16xf32>
    %c0_25 = arith.constant 0 : index
    %c0_26 = arith.constant 0 : index
    %c0_27 = arith.constant 0 : index
    %46 = vector.load %arg9[%c0_25, %c0_26, %c0_27] : memref<1x8x16xf32, #tpu.memory_space<vmem>>, vector<1x8x16xf32>
    %47 = vector.shape_cast %46 : vector<1x8x16xf32> to vector<8x16xf32>
    %48 = vector.shape_cast %45 : vector<8x16xf32> to vector<1x8x16xf32>
    tpu.vector_store %arg9[%c0_25, %c0_26, %c0_27], %48 {strides = array<i32>} : memref<1x8x16xf32, #tpu.memory_space<vmem>>, vector<1x8x16xf32>,
    return
  }
  func.func @transform_0(%arg0: i32, %arg1: i32) -> (i32, i32, i32) {
    %c0_i32 = arith.constant 0 : i32
    %c0_i32_0 = arith.constant 0 : i32
    return %arg0, %c0_i32, %arg1 : i32, i32, i32
  }
  func.func @transform_1(%arg0: i32, %arg1: i32) -> (i32, i32, i32) {
    %c0_i32 = arith.constant 0 : i32
    %c0_i32_0 = arith.constant 0 : i32
    return %arg0, %c0_i32, %arg1 : i32, i32, i32
  }
  func.func @transform_2(%arg0: i32, %arg1: i32) -> (i32, i32, i32, i32) {
    %c0_i32 = arith.constant 0 : i32
    %c0_i32_0 = arith.constant 0 : i32
    %c0_i32_1 = arith.constant 0 : i32
    return %arg0, %arg1, %c0_i32, %c0_i32_0 : i32, i32, i32, i32
  }
  func.func @transform_3(%arg0: i32, %arg1: i32) -> (i32, i32, i32, i32) {
    %c0_i32 = arith.constant 0 : i32
    %c0_i32_0 = arith.constant 0 : i32
    %c0_i32_1 = arith.constant 0 : i32
    return %arg0, %arg1, %c0_i32, %c0_i32_0 : i32, i32, i32, i32
  }
  func.func @transform_4(%arg0: i32, %arg1: i32) -> (i32, i32) {
    %c0_i32 = arith.constant 0 : i32
    %c0_i32_0 = arith.constant 0 : i32
    %c0_i32_1 = arith.constant 0 : i32
    return %c0_i32, %c0_i32_0 : i32, i32
  }
  func.func @transform_5(%arg0: i32, %arg1: i32) -> (i32, i32, i32) {
    %c0_i32 = arith.constant 0 : i32
    %c0_i32_0 = arith.constant 0 : i32
    %c0_i32_1 = arith.constant 0 : i32
    %c0_i32_2 = arith.constant 0 : i32
    return %c0_i32, %c0_i32_0, %c0_i32_1 : i32, i32, i32
  }
  func.func @transform_6(%arg0: i32, %arg1: i32) -> (i32, i32, i32) {
    %c0_i32 = arith.constant 0 : i32
    %c0_i32_0 = arith.constant 0 : i32
    return %arg0, %c0_i32, %arg1 : i32, i32, i32
  }
  func.func @transform_7(%arg0: i32, %arg1: i32) -> (i32, i32, i32) {
    %c0_i32 = arith.constant 0 : i32
    %c0_i32_0 = arith.constant 0 : i32
    return %arg0, %c0_i32, %arg1 : i32, i32, i32
  }
}

</mosaic_0001>

<bundles_post_ra>
// kernel: tpu_custom_call.1
= control target key start
LH: loop header
LB: loop body
LE: loop exit
PB: predicated region body
PF: predicated region fallthrough
CT: control target
= control target key end

     0   :  { %s1201_s0 = inlined_call_operand.vmem [shape: f32[2,4,16], index: 0, kind: input, shape index: {}]   ;;  %s1202_s1 = inlined_call_operand.vmem [shape: f32[2,4,16], index: 1, kind: input, shape index: {}]   ;;  %s1203_s2 = inlined_call_operand.vmem [shape: f32[2,1,4,2], index: 2, kind: input, shape index: {}]   ;;  %s1204_s3 = inlined_call_operand.vmem [shape: f32[2,1,4,2], index: 3, kind: input, shape index: {}]   ;;  %s1205_s4 = inlined_call_operand.vmem [shape: f32[32,24], index: 4, kind: input, shape index: {}]   ;;  %s1206_s5 = inlined_call_operand.vmem [shape: f32[2,8,1], index: 5, kind: input, shape index: {}]   ;;  %s1207_s6 = inlined_call_operand.hbm [shape: f32[2,8,16], index: 6, kind: output, shape index: {0}]   ;;  %s1208_s7 = inlined_call_operand.hbm [shape: f32[2,8,16], index: 7, kind: output, shape index: {1}]  }
   0x1   :  { %1209 = sst [smem:[#allocation8_spill]] %s1201_s0 }
   0x2   :  { %13 = vsyncpa [#allocation3], 0 }
   0x3   :  { %15 = vsyncpa [#allocation3 + $0x1], 0 }
   0x4   :  { %16 = vsyncpa [#allocation5], 0 }
   0x5   :  { %18 = vsyncpa [#allocation5 + $0x1], 0  ;;  %s1025_s24 = smov 0   ;;  %s1027_s25 = smov 0  }
   0x6   :  { %s1029_s26 = smov 0   ;;  %s1031_s27 = smov 0  }
   0x7   :  { %s1033_s28 = smov 0   ;;  %s1035_s29 = smov 0  }
   0x8 LB: > { %s747_s30 = sadd.s32 4294967295, %s977_s29   ;;  %s748_s8 = sadd.s32 4294967294, %s977_s29   ;;  %s977_s29 = sphi %s1035_s29, %s24_s29   ;;  %s973_s28 = sphi %s1033_s28, %s1217_s28   ;;  %s969_s27 = sphi %s1031_s27, %s1216_s27   ;;  %s965_s26 = sphi %s1029_s26, %s1215_s26   ;;  %s961_s25 = sphi %s1027_s25, %s1214_s25   ;;  %s957_s24 = sphi %s1025_s24, %s1213_s24  }
   0x9   : > { %s36_s9 = sadd.s32 1, %s973_s28  ;;  %s199_s10 = sadd.s32 1, %s965_s26 }
   0xa   : > { %p38_p0 = scmp.ge.s32.totalorder %s36_s9, 2  ;;  %p209_p1 = scmp.ne.s32.totalorder %s965_s26, %s961_s25 }
   0xb   : > { %p210_p2 = scmp.eq.s32.totalorder %s747_s30, 1  ;;  %p215_p3 = scmp.ne.s32.totalorder %s961_s25, %s957_s24 }
   0xc   : > { %s1219_s9 = smov (%p38_p0, %s36_s9), 0  ;;  %p216_p5 = scmp.eq.s32.totalorder %s748_s8, 1 }
   0xd   : > { %p1065_p4 = por %p210_p2, %p209_p1  ;;  %s194_s12 = ssub.s32 %s973_s28, %s1219_s9 }
   0xe   : > { %p751_p6 = scmp.ge.s32.totalorder %s977_s29, 1  ;;  %p197_p7 = scmp.eq.s32.totalorder %s194_s12, 0 }
   0xf   : > { %p1072_p8 = por %p216_p5, %p215_p3  ;;  %p308_p9 = scmp.lt.s32.totalorder %s977_s29, 3 }
  0x10   : > { %s1078_s14 = scalar_select %p197_p7, %s965_s26, %s199_s10  }
  0x11   : > { %p309_p10 = pnand %p751_p6, %p308_p9 }
  0x12   : > { %p368_p11 = scmp.lt.s32.totalorder (!%p309_p10), %s969_s27, 1  ;;  %s1212_s0 = sld [smem:[#allocation8_spill]] (!%p309_p10)  ;;  %v440_v4 = vld [vmem:[%s1205_s4] sm:$0xff] (!%p309_p10)  ;;  %vm444_vm0 = vcmask (!%p309_p10), 195584   ;;  %v442_v5 = vld [vmem:[%s1205_s4 + $0x10] sm:$0xff] (!%p309_p10)  ;;  %v981_v6 = vmov (!%p309_p10), 0  }
  0x13   : > { %312 = sbr.rel (%p309_p10) target bundleno = 419 (0x1a3), region = 44  ;;  %s979_s10 = smov (!%p309_p10), 14   ;;  %782 = vmatprep.mubr.msk.f32.mxu0 (!%p309_p10), %vm444_vm0, %v440_v4  ;;  %785 = vmatprep.mubr.msk.f32.mxu1 (!%p309_p10), %vm444_vm0, %v442_v5  ;;  %v542_v7 = vld [vmem:[%s1206_s5] sm:$0xff] (!%p309_p10)  ;;  %v762_v9 = vld [vmem:[%s1206_s5 + $0x8] sm:$0xff] (!%p309_p10)  ;;  %vm402_vm1 = vcmask (!%p309_p10), 7168   ;;  %vm411_vm2 = vcmask (!%p309_p10), 121856  }
  0x14   : > { %s980_s20 = smov (!%p309_p10), 1   ;;  %866 = vset.pattern.permute.xlu0 (!%p309_p10), %v981_v6  ;;  %865 = vset.pattern.permute.xlu1 (!%p309_p10), %v981_v6  ;;  %s982_s23 = smov (!%p309_p10), 127   ;;  %vm436_vm3 = vcmask (!%p309_p10), 1043456   ;;  %v441_v28 = vld [vmem:[%s1205_s4 + $0x8] sm:$0xff] (!%p309_p10)  ;;  %v443_v29 = vld [vmem:[%s1205_s4 + $0x18] sm:$0xff] (!%p309_p10)  ;;  %vm551_vm4 = vcmask (!%p309_p10), 130048  }
  0x15   : > { %s765_s21 = sshll.u32 (!%p309_p10), %s969_s27, 7  ;;  %s983_s12 = smov (!%p309_p10), [#allocation2]  }
  0x16   : > { %s1131_s17 = scalar_lea.hbm (!%p309_p10), %s1208_s7, %s765_s21 }
  0x1a   : > { %s369_s15 = scalar_select %p368_p11, %s969_s27, 1 }
  0x1c   : > { %s754_s16 = sshll.u32 %s369_s15, 2  ;;  %s871_s15 = sshll.u32 %s983_s12, 4  ;;  %s872_s15 = int_to_ptr.vmem [resolvable:$false] %s871_s15 }
  0x1d   : > { %s374_s19 = scalar_lea.vmem %s1212_s0, %s754_s16  ;;  %s381_s22 = scalar_lea.vmem %s1202_s1, %s754_s16 }
  0x1e   : > { %v396_v0 = vld [vmem:[%s374_s19] sm:$0xf]  ;;  %s388_s8 = scalar_lea.vmem %s1203_s2, %s754_s16  ;;  %s873_s0 = scalar_lea.vmem %s872_s15, 256 }
  0x1f   : > { %v413_v1 = vld [vmem:[%s381_s22] sm:$0xf]  ;;  %s395_s22 = scalar_lea.vmem %s1204_s3, %s754_s16  ;;  %v428_v14 = vrot.slane %v396_v0, 4  ;;  %s1124_s16 = scalar_lea.hbm %s1207_s6, %s765_s21 }
  0x20   : > { %v860_v2 = vpack.i.bf16 %v396_v0, %v413_v1  ;;  %v397_v3 = vld [vmem:[%s388_s8] sm:$0xf] }
  0x21   : > { %408 = vrot.lane.b32.xlu1 %v397_v3, %s979_s10  ;;  %v414_v8 = vld [vmem:[%s395_s22] sm:$0xf] }
  0x22   : > { %861 = vrot.lane.b32.xlu0 %v860_v2, %s980_s20  ;;  %s1117_s20 = sand.u32 1, %s961_s25  }
  0x23   : > { %s752_s19 = sshll.u32 %s1117_s20, 3  ;;  %s565_s18 = scalar_lea.sflag [#allocation3], %s1117_s20 }
  0x24   : > { %s360_s22 = scalar_lea.vmem [#allocation2], %s752_s19  ;;  %s367_s30 = scalar_lea.vmem [#allocation4], %s752_s19 }
  0x25   : > { %420 = vrot.lane.b32.xlu1 %v413_v1, %s982_s23  ;;  %s598_s8 = sshll.u32 %s367_s30, 4  ;;  %s1133_s8 = int_to_ptr.vmem [resolvable:$true] %s598_s8 }
  0x26   : > { %404 = vrot.lane.b32.xlu0 %v396_v0, %s982_s23  ;;  %s584_s23 = sshll.u32 %s360_s22, 4  ;;  %s1126_s23 = int_to_ptr.vmem [resolvable:$true] %s584_s23 }
  0x27   : > { %s867_s19 = scalar_lea.vmem %s1126_s23, 128  ;;  %p874_p1 = scmp.lt.s32.totalorder %s1126_s23, %s872_s15 }
  0x28   : > { %p868_p12 = scmp.ne.s32.totalorder %s1126_s23, %s867_s19  ;;  %p875_p2 = scmp.lt.s32.totalorder %s873_s0, %s867_s19 }
  0x29   : > { %545 = vperm.xlu1 %865, %v542_v7  }
  0x2a   : > { %424 = vrot.lane.b32.xlu0 %v414_v8, %s979_s10  ;;  %p869_p13 = pnand %p868_p12, %p1065_p4  ;;  %p876_p3 = por %p875_p2, %p874_p1 }
  0x2c   : > { %p870_p0 = pneg %p869_p13 }
  0x2e   : > { %557 = vperm.xlu0 %866, %v762_v9   ;;  %p877_p5 = pnand %p876_p3, %p870_p0 }
  0x93   : > { %v409_v11 = vpop.permute.xlu1 %408 }
  0x94   : > { %v862_v10 = vpop.permute.xlu0 %861 }
  0x95   : > { %v864_v12 = vunpack.i.h.bf16 %v862_v10  ;;  %v863_v13 = vunpack.i.l.bf16 %v862_v10 }
  0x97   : > { %v403_v15 = vsel %vm402_vm1, %v397_v3, %v864_v12  ;;  %v419_v16 = vsel %vm402_vm1, %v414_v8, %v863_v13  ;;  %v421_v22 = vpop.permute.xlu1 %420 }
  0x98   : > { %v431_v17 = vrot.slane %v419_v16, 4  ;;  %v405_v18 = vpop.permute.xlu0 %404  ;;  %v437_v20 = vsel %vm436_vm3, %v403_v15, %v428_v14 }
  0x99   : > { %v412_v19 = vsel %vm411_vm2, %v405_v18, %v409_v11 }
  0x9a   : > { %v438_v21 = vsel %vm436_vm3, %v412_v19, %v431_v17 }
  0x9b   : > { %v788_v23 = vpack.c.bf16 %v438_v21, %v437_v20 }
  0x9c   : > { %v425_v24 = vpop.permute.xlu0 %424 }
  0x9d   : > { %v427_v25 = vsel %vm411_vm2, %v421_v22, %v425_v24  ;;  %789 = vmatprep.subr.bf16.mxu0 %v788_v23  ;;  %792 = vmatprep.subr.bf16.mxu1 %v788_v23 }
  0x9e   : > { %v434_v26 = vrot.slane %v427_v25, 4  ;;  %791 = vmatpush3.bf16.msra.mxu0 %v788_v23  ;;  %794 = vmatpush3.bf16.msra.mxu1 %v788_v23 }
  0xa0   : > { %v439_v27 = vsel %vm436_vm3, %v413_v1, %v434_v26 }
  0xa1   : > { %780 = vmatprep.subr.mxu0 %v439_v27  ;;  %793 = vmatprep.subr.mxu1 %v439_v27 }
  0xa2   : > { %781 = vmatpush3.msra.mxu0 %v439_v27  ;;  %795 = vmatpush3.msra.mxu1 %v439_v27 }
  0xa3   : > { %783 = vmatmul.mubr.msk.f32.vlgmr.msra.gmra.mrb[0].mxu0 %vm444_vm0, %v441_v28  ;;  %786 = vmatmul.mubr.msk.f32.vlgmr.msra.gmra.mrb[0].mxu1 %vm444_vm0, %v443_v29 }
  0xa8   : > { %v546_v30 = vpop.permute.xlu1 %545 }
  0xad   : > { %v558_v31 = vpop.permute.xlu0 %557 }
 0x176   : > { %v784_v32 = vpop.f32.mrb[0].mxu0  ;;  %v787_v33 = vpop.f32.mrb[0].mxu1 }
 0x177   : > { %v523_v34 = vpop.f32.mrb[1].mxu0  ;;  %v533_v35 = vpop.f32.mrb[1].mxu1 }
 0x178   : > { %v548_v36 = vadd.f32 %v546_v30, %v523_v34  ;;  %v560_v37 = vadd.f32 %v558_v31, %v533_v35 }
 0x17a   : > { %v549_v38 = vmax.f32 %v548_v36, 0.0  ;;  %v561_v39 = vmax.f32 %v560_v37, 0.0 }
 0x17c   : > { %v550_v40 = vadd.f32 %v784_v32, %v549_v38  ;;  %v562_v41 = vadd.f32 %v787_v33, %v561_v39 }
 0x17e   : > { %552 = vst.msk [vmem:[%s360_s22] sm:$0xff] %vm551_vm4, %v550_v40  ;;  %563 = vst.msk [vmem:[%s367_s30] sm:$0xff] %vm551_vm4, %v562_v41 }
 0x17f   : > { %880 = shalt.err (!%p877_p5)
}
 0x180   : > { %s881_s21 = scalar_lea.hbm %s1124_s16, 128  ;;  %s885_s10 = scalar_lea.hbm %s1207_s6, 256 }
 0x181   : > { %p882_p6 = scmp.ne.s32.totalorder %s1124_s16, %s881_s21  ;;  %p886_p10 = scmp.lt.u32.totalorder %s1124_s16, %s1207_s6 }
 0x182   : > { %p887_p11 = scmp.lt.u32.totalorder %s885_s10, %s881_s21  ;;  %p889_p13 = scmp.lt.u32.totalorder %s881_s21, %s1124_s16 }
 0x183   : > { %p883_p7 = pnand %p882_p6, %p1065_p4 }
 0x184   : > { %p888_p12 = por %p887_p11, %p886_p10 }
 0x185   : > { %p884_p9 = pneg %p883_p7 }
 0x186   : > { %p890_p0 = por %p889_p13, %p888_p12 }
 0x188   : > { %p891_p1 = pnand %p890_p0, %p884_p9 }
 0x18a   : > { %894 = shalt.err (!%p891_p1)
}
 0x18b   : > { %796 = dma.vmem_to_hbm [thread:$0]  (%p1065_p4), %s1126_s23, 128, %s1124_s16, %s565_s18  }
 0x18c   : > { %s570_s0 = scalar_lea.sflag [#allocation5], %s1117_s20  ;;  %s895_s19 = scalar_lea.vmem %s1133_s8, 128 }
 0x18d   : > { %p896_p2 = scmp.ne.s32.totalorder %s1133_s8, %s895_s19  ;;  %s984_s15 = smov [#allocation4]  }
 0x18e   : > { %s899_s21 = sshll.u32 %s984_s15, 4  ;;  %s900_s21 = int_to_ptr.vmem [resolvable:$false] %s899_s21 }
 0x18f   : > { %p897_p3 = pnand %p896_p2, %p1065_p4  ;;  %s901_s22 = scalar_lea.vmem %s900_s21, 256 }
 0x190   : > { %p902_p6 = scmp.lt.s32.totalorder %s1133_s8, %s900_s21  ;;  %p903_p7 = scmp.lt.s32.totalorder %s901_s22, %s895_s19 }
 0x191   : > { %p898_p5 = pneg %p897_p3 }
 0x192   : > { %p904_p9 = por %p903_p7, %p902_p6 }
 0x194   : > { %p905_p10 = pnand %p904_p9, %p898_p5 }
 0x196   : > { %908 = shalt.err (!%p905_p10)
}
 0x197   : > { %s909_s20 = scalar_lea.hbm %s1131_s17, 128  ;;  %s913_s18 = scalar_lea.hbm %s1208_s7, 256 }
 0x198   : > { %p910_p11 = scmp.ne.s32.totalorder %s1131_s17, %s909_s20  ;;  %p914_p0 = scmp.lt.u32.totalorder %s1131_s17, %s1208_s7 }
 0x199   : > { %p915_p1 = scmp.lt.u32.totalorder %s913_s18, %s909_s20  ;;  %p917_p3 = scmp.lt.u32.totalorder %s909_s20, %s1131_s17 }
 0x19a   : > { %p911_p12 = pnand %p910_p11, %p1065_p4 }
 0x19b   : > { %p916_p2 = por %p915_p1, %p914_p0 }
 0x19c   : > { %p912_p13 = pneg %p911_p12 }
 0x19d   : > { %p918_p5 = por %p917_p3, %p916_p2 }
 0x19f   : > { %p919_p6 = pnand %p918_p5, %p912_p13 }
 0x1a1   : > { %922 = shalt.err (!%p919_p6)
}
 0x1a2   : > { %797 = dma.vmem_to_hbm [thread:$0]  (%p1065_p4), %s1133_s8, 128, %s1131_s17, %s570_s0  }
 0x1a3 PF: > { %p807_p7 = scmp.ge.s32.totalorder %s977_s29, 2  ;;  %s610_s27 = sand.u32 1, %s957_s24  }
 0x1a4   : > { %s611_s12 = scalar_lea.sflag [#allocation3], %s610_s27 }
 0x1a5   : > { %p801_p9 = pnand %p807_p7, %p1072_p8 }
 0x1a7   : > { %948 = dma.done.wait (!%p801_p9), %s611_s12, 128  }
 0x1a8   : > { %950 = vsyncadd (!%p801_p9), %s611_s12, 4294967168  ;;  %s620_s19 = scalar_lea.sflag [#allocation5], %s610_s27 }
 0x1a9   : > { %952 = dma.done.wait (!%p801_p9), %s620_s19, 128  }
 0x1aa   : > { %954 = vsyncadd (!%p801_p9), %s620_s19, 4294967168  ;;  %s24_s29 = sadd.s32 1, %s977_s29   ;;  %s1213_s24 = smov %s961_s25 }
 0x1ab   : > { %p21_p10 = scmp.ge.s32.totalorder %s24_s29, 4   ;;  %s1214_s25 = smov %s965_s26 }
 0x1ac   : > { %s1215_s26 = smov %s1078_s14  ;;  %s1216_s27 = smov %s973_s28 }
 0x1ad   : > { %s1217_s28 = smov %s1219_s9  ;;  %23 = sbr.rel (!%p21_p10) target bundleno = 8 (0x8), region = 106 }
 0x1b4   :  { %625 = vsyncpa [#allocation3], 1 }
 0x1b5   :  { %627 = vsyncpa [#allocation3 + $0x1], 1 }
 0x1b6   :  { %628 = vsyncpa [#allocation5], 1 }
 0x1b7   :  { %630 = vsyncpa [#allocation5 + $0x1], 1 }

</bundles_post_ra>
